<compile_context>
chip_gen: v7x
topology: tpu7x:2x2x1
jax: 0.10.0
libtpu: 0.0.40
codegen_flags: <defaults>
</compile_context>

<pallas_src>
from functools import partial

import jax
import jax.numpy as jnp
from jax.experimental import pallas as pl
from jax.experimental.pallas import tpu as pltpu  # noqa: F401  (TPU backend)


def make_mlp_kernel(n_feature, n_hidden, n_output):
    """Fused kernel.  Inputs:
         xt_ref: (F, Npad)  -- batch on lanes
         p_ref : (H, F+H+O+3) packed params:
                 [ w1 (H,F) | b1 (H,1) | w2 (H,H) | b2 (H,1) | w3.T (H,O) | b3 (H,1, rows<O valid) ]
       Output: (O, Npad)."""
    F, H, O = n_feature, n_hidden, n_output
    c_w1 = 0
    c_b1 = F
    c_w2 = F + 1
    c_b2 = F + 1 + H
    c_w3 = F + 2 + H
    c_b3 = F + 2 + H + O

    def kernel(xt_ref, p_ref, o_ref):
        xt = xt_ref[...]                                   # (F, Npad)

        w1 = p_ref[:, c_w1:c_w1 + F]                       # (H, F)
        b1 = p_ref[:, c_b1:c_b1 + 1]                       # (H, 1)
        w2 = p_ref[:, c_w2:c_w2 + H]                       # (H, H)
        b2 = p_ref[:, c_b2:c_b2 + 1]                       # (H, 1)
        w3t = p_ref[:, c_w3:c_w3 + O]                      # (H, O)
        b3 = p_ref[:O, c_b3:c_b3 + 1]                      # (O, 1)

        # ---- hidden1 + ReLU ----
        if F == 1:
            # K=1 contraction == rank-1 outer product: keep it on the VPU.
            h1 = w1 * xt                                   # (H,1)*(1,Npad)->(H,Npad)
        elif F < 8:
            # Small-K rank-k update on the VPU; avoids a wasted MXU pass.
            h1 = w1[:, 0:1] * xt[0:1, :]
            for f in range(1, F):
                h1 = h1 + w1[:, f:f + 1] * xt[f:f + 1, :]
        else:
            h1 = jnp.dot(w1, xt, preferred_element_type=jnp.float32)
        h1 = jnp.maximum(h1 + b1, 0.0)                     # (H, Npad)

        # ---- hidden2 + ReLU (the only real matmul -> MXU, lane-dense) ----
        h2 = jnp.dot(w2, h1, preferred_element_type=jnp.float32)
        h2 = jnp.maximum(h2 + b2, 0.0)                     # (H, Npad)

        # ---- predict (no activation) ----
        if O == 1:
            # N=1 contraction: VPU multiply + sublane (XLU) reduction.
            out = jnp.sum(w3t * h2, axis=0, keepdims=True)  # (1, Npad)
        else:
            out = jnp.dot(w3t.T, h2, preferred_element_type=jnp.float32)
        o_ref[...] = (out + b3).astype(o_ref.dtype)

    return kernel


def pack_params(params):
    """Pack all weights/biases into a single (H, F+H+O+3) f32 buffer (done once)."""
    H, F = params["w1"].shape
    O = params["w3"].shape[0]
    b3_col = jnp.zeros((H, 1), jnp.float32).at[:O, 0].set(params["b3"])
    packed = jnp.concatenate(
        [
            params["w1"],               # (H, F)
            params["b1"][:, None],      # (H, 1)
            params["w2"],               # (H, H)
            params["b2"][:, None],      # (H, 1)
            params["w3"].T,             # (H, O)
            b3_col,                     # (H, 1)
        ],
        axis=1,
    ).astype(jnp.float32)
    return packed


@partial(jax.jit, static_argnames=("n_feature", "n_hidden", "n_output"))
def net_forward(x, packed, *, n_feature, n_hidden, n_output):
    """x: (N, n_feature) float32.  packed: output of pack_params()."""
    n = x.shape[0]
    n_pad = 128 * ((n + 127) // 128)

    # Transpose (batch -> lanes) and pad lanes to a 128 multiple; fused under jit.
    xt = jnp.pad(x.T.astype(jnp.float32), ((0, 0), (0, n_pad - n)))

    full = lambda shape: pl.BlockSpec(shape, lambda: (0,) * len(shape))

    out_t = pl.pallas_call(
        make_mlp_kernel(n_feature, n_hidden, n_output),
        out_shape=jax.ShapeDtypeStruct((n_output, n_pad), jnp.float32),
        grid=(),
        in_specs=[full(xt.shape), full(packed.shape)],
        out_specs=full((n_output, n_pad)),
    )(xt, packed)

    # Back to PyTorch layout (N, n_output); drop batch padding.
    return out_t[:, :n].T


def init_params(key, n_feature, n_hidden, n_output):
    """Deterministic synthetic init with PyTorch nn.Linear shapes (out, in)."""
    ks = jax.random.split(key, 6)

    def u(k, shape, fan_in):
        bound = 1.0 / jnp.sqrt(fan_in)
        return jax.random.uniform(k, shape, jnp.float32, -bound, bound)

    return {
        "w1": u(ks[0], (n_hidden, n_feature), n_feature),
        "b1": u(ks[1], (n_hidden,), n_feature),
        "w2": u(ks[2], (n_hidden, n_hidden), n_hidden),
        "b2": u(ks[3], (n_hidden,), n_hidden),
        "w3": u(ks[4], (n_output, n_hidden), n_hidden),
        "b3": u(ks[5], (n_output,), n_hidden),
    }


if __name__ == "__main__":
    n_feature, n_hidden, n_output = 1, 32, 1
    key = jax.random.PRNGKey(0)

    # Mirror the script's input: x = unsqueeze(linspace(-1, 1, 100), dim=1)
    x = jnp.linspace(-1.0, 1.0, 100, dtype=jnp.float32)[:, None]

    params = init_params(key, n_feature, n_hidden, n_output)
    packed = pack_params(params)   # single packed weight buffer, built once

    out = net_forward(x, packed,
                      n_feature=n_feature, n_hidden=n_hidden, n_output=n_output)
    out = jax.block_until_ready(out)

    # Pure-JAX reference check (PyTorch semantics: y = x @ W.T + b)
    ref = x
    ref = jnp.maximum(ref @ params["w1"].T + params["b1"], 0.0)
    ref = jnp.maximum(ref @ params["w2"].T + params["b2"], 0.0)
    ref = ref @ params["w3"].T + params["b3"]
    assert out.shape == (100, n_output)
    assert jnp.allclose(out, ref, atol=1e-5), "mismatch vs JAX reference"

    print("KERNEL_OK")
</pallas_src>

<mosaic_0001>
module attributes {stable_mosaic.version = 11 : i64} {
  func.func @kernel(%arg0: memref<1x128xf32, #tpu.memory_space<vmem>>, %arg1: memref<32x37xf32, #tpu.memory_space<vmem>>, %arg2: memref<1x128xf32, #tpu.memory_space<vmem>>) attributes {dimension_semantics = [], scalar_prefetch = 0 : i64, scratch_operands = 0 : i64, tpu.core_type = #tpu.core_type<tc>} {
    %c0 = arith.constant 0 : index
    %c0_0 = arith.constant 0 : index
    %0 = vector.load %arg0[%c0, %c0_0] : memref<1x128xf32, #tpu.memory_space<vmem>>, vector<1x128xf32>
    %c0_1 = arith.constant 0 : index
    %c0_2 = arith.constant 0 : index
    %1 = vector.load %arg1[%c0_1, %c0_2] : memref<32x37xf32, #tpu.memory_space<vmem>>, vector<32x1xf32>
    %c0_3 = arith.constant 0 : index
    %c1 = arith.constant 1 : index
    %2 = vector.load %arg1[%c0_3, %c1] : memref<32x37xf32, #tpu.memory_space<vmem>>, vector<32x1xf32>
    %c0_4 = arith.constant 0 : index
    %c2 = arith.constant 2 : index
    %3 = vector.load %arg1[%c0_4, %c2] : memref<32x37xf32, #tpu.memory_space<vmem>>, vector<32x32xf32>
    %c0_5 = arith.constant 0 : index
    %c34 = arith.constant 34 : index
    %4 = vector.load %arg1[%c0_5, %c34] : memref<32x37xf32, #tpu.memory_space<vmem>>, vector<32x1xf32>
    %c0_6 = arith.constant 0 : index
    %c35 = arith.constant 35 : index
    %5 = vector.load %arg1[%c0_6, %c35] : memref<32x37xf32, #tpu.memory_space<vmem>>, vector<32x1xf32>
    %c0_7 = arith.constant 0 : index
    %c36 = arith.constant 36 : index
    %6 = vector.load %arg1[%c0_7, %c36] : memref<32x37xf32, #tpu.memory_space<vmem>>, vector<1x1xf32>
    %7 = vector.broadcast %1 : vector<32x1xf32> to vector<32x128xf32>
    %8 = vector.broadcast %0 : vector<1x128xf32> to vector<32x128xf32>
    %9 = arith.mulf %7, %8 : vector<32x128xf32>
    %10 = vector.broadcast %2 : vector<32x1xf32> to vector<32x128xf32>
    %11 = arith.addf %9, %10 : vector<32x128xf32>
    %cst = arith.constant 0.000000e+00 : f32
    %12 = vector.broadcast %cst : f32 to vector<32x128xf32>
    %13 = arith.maximumf %11, %12 : vector<32x128xf32>
    %cst_8 = arith.constant dense<0.000000e+00> : vector<32x128xf32>
    %14 = tpu.matmul %3, %13, %cst_8 {dimension_numbers = #tpu.dot_dimension_numbers<[1], [0], [0], [1], [0, 0, 1, 1], [], []>} : vector<32x32xf32>, vector<32x128xf32>, vector<32x128xf32> -> vector<32x128xf32>
    %15 = vector.broadcast %4 : vector<32x1xf32> to vector<32x128xf32>
    %16 = arith.addf %14, %15 : vector<32x128xf32>
    %cst_9 = arith.constant 0.000000e+00 : f32
    %17 = vector.broadcast %cst_9 : f32 to vector<32x128xf32>
    %18 = arith.maximumf %16, %17 : vector<32x128xf32>
    %19 = vector.broadcast %5 : vector<32x1xf32> to vector<32x128xf32>
    %20 = arith.mulf %19, %18 : vector<32x128xf32>
    %cst_10 = arith.constant dense<0.000000e+00> : vector<128xf32>
    %21 = vector.multi_reduction <add>, %20, %cst_10 [0] : vector<32x128xf32> to vector<128xf32>
    %22 = vector.shape_cast %21 : vector<128xf32> to vector<1x128xf32>
    %23 = vector.broadcast %6 : vector<1x1xf32> to vector<1x128xf32>
    %24 = arith.addf %22, %23 : vector<1x128xf32>
    %c0_11 = arith.constant 0 : index
    %c0_12 = arith.constant 0 : index
    %25 = vector.load %arg2[%c0_11, %c0_12] : memref<1x128xf32, #tpu.memory_space<vmem>>, vector<1x128xf32>
    tpu.vector_store %arg2[%c0_11, %c0_12], %24 {strides = array<i32>} : memref<1x128xf32, #tpu.memory_space<vmem>>, vector<1x128xf32>,
    return
  }
}

</mosaic_0001>

<bundles_post_ra>
// kernel: net_forward.1
= control target key start
LH: loop header
LB: loop body
LE: loop exit
PB: predicated region body
PF: predicated region fallthrough
CT: control target
= control target key end

     0   :  { %7 = vsyncpa [#allocation3], 0  ;;  %s331_s9 = smov [#allocation2]   ;;  %s373_s0 = inlined_call_operand.vmem [shape: f32[1,128], index: 0, kind: input, shape index: {}]   ;;  %s374_s1 = inlined_call_operand.hbm [shape: f32[32,37], index: 1, kind: input, shape index: {}]   ;;  %s375_s2 = inlined_call_operand.vmem [shape: f32[1,128], index: 2, kind: output, shape index: {}]  }
   0x1   :  { %s15_s10 = sshll.u32 %s331_s9, 4  ;;  %s307_s13 = scalar_lea.hbm %s374_s1, 512  ;;  %s16_s10 = int_to_ptr.vmem [resolvable:$true] %s15_s10 }
   0x2   :  { %p308_p0 = scmp.ne.s32.totalorder %s374_s1, %s307_s13  ;;  %p311_p1 = scmp.lt.u32.totalorder %s307_s13, %s374_s1 }
   0x4   :  { %p313_p2 = pnand %p311_p1, %p308_p0 }
   0x6   :  { %316 = shalt.err (!%p313_p2)
}
   0x7   :  { %s317_s18 = scalar_lea.vmem %s16_s10, 512  ;;  %p322_p4 = scmp.lt.s32.totalorder %s16_s10, %s16_s10 }
   0x8   :  { %p318_p3 = scmp.ne.s32.totalorder %s16_s10, %s317_s18  ;;  %p323_p5 = scmp.lt.s32.totalorder %s317_s18, %s317_s18 }
   0xa   :  { %p324_p6 = por %p323_p5, %p322_p4 }
   0xc   :  { %p325_p7 = pnand %p324_p6, %p318_p3 }
   0xe   :  { %328 = shalt.err (!%p325_p7)
}
   0xf   :  { %s332_s19 = smov 128   ;;  %s333_s20 = smov 8  }
  0x10   :  { %21 = dma.hbm_to_vmem [thread:$0]  %s374_s1, 512, %s16_s10, [#allocation3], %s332_s19, %s332_s19, %s333_s20  }
  0x11   :  { %329 = dma.done.wait [#allocation3], 512  }
  0x12   :  { %330 = vsyncadd [#allocation3], 4294966784  ;;  %v334_v0 = vmov 1   ;;  %v335_v1 = vmov 0   ;;  %v26_v2 = vld [vmem:[#allocation2] sm:$0xff]  ;;  %v27_v3 = vld [vmem:[#allocation2 + $0x8] sm:$0xff] }
  0x13   :  { %297 = vset.pattern.permute.xlu1 %v334_v0  ;;  %296 = vset.pattern.permute.xlu0 %v335_v1  ;;  %v28_v4 = vld [vmem:[#allocation2 + $0x10] sm:$0xff]  ;;  %v29_v5 = vld [vmem:[#allocation2 + $0x18] sm:$0xff]  ;;  %s336_s1 = smov 126   ;;  %v337_v6 = vmov 34   ;;  %v338_v7 = vmov 35   ;;  %v339_v8 = vmov 36  }
  0x14   :  { %62 = vperm.xlu1 %297, %v26_v2   ;;  %33 = vperm.xlu0 %296, %v26_v2   ;;  %v30_v9 = vld [vmem:[#allocation2] sm:$0x1]  ;;  %vm109_vm0 = vcmask 261120  }
  0x15   :  { %v248_v10 = vld [vmem:[%s373_s0] ss:$0 sm:$0xff] }
  0x18   :  { %66 = vperm.xlu1 %297, %v27_v3   ;;  %38 = vperm.xlu0 %296, %v27_v3  }
  0x1c   :  { %298 = vset.pattern.permute.xlu1 %v335_v1  ;;  %43 = vperm.xlu0 %296, %v28_v4  }
  0x1d   :  { %48 = vperm.xlu1 %298, %v29_v5  }
  0x20   :  { %299 = vset.pattern.permute.xlu0 %v334_v0 }
  0x21   :  { %300 = vset.pattern.permute.xlu1 %v334_v0  ;;  %70 = vperm.xlu0 %299, %v28_v4  }
  0x22   :  { %74 = vperm.xlu1 %300, %v29_v5  }
  0x25   :  { %103 = vrot.lane.b32.xlu0 %v27_v3, %s336_s1 }
  0x26   :  { %101 = vrot.lane.b32.xlu1 %v26_v2, %s336_s1  ;;  %302 = vset.pattern.permute.xlu0 %v337_v6 }
  0x27   :  { %301 = vset.pattern.permute.xlu1 %v337_v6 }
  0x29   :  { %107 = vrot.lane.b32.xlu0 %v29_v5, %s336_s1 }
  0x2a   :  { %105 = vrot.lane.b32.xlu1 %v28_v4, %s336_s1 }
  0x2d   :  { %90 = vperm.xlu0 %302, %v27_v3  }
  0x2e   :  { %86 = vperm.xlu1 %301, %v26_v2  }
  0x31   :  { %303 = vset.pattern.permute.xlu0 %v338_v7 }
  0x32   :  { %94 = vperm.xlu1 %301, %v28_v4   ;;  %208 = vperm.xlu0 %303, %v26_v2  }
  0x36   :  { %98 = vperm.xlu1 %301, %v29_v5   ;;  %220 = vperm.xlu0 %303, %v29_v5  }
  0x3a   :  { %304 = vset.pattern.permute.xlu1 %v338_v7  ;;  %306 = vset.pattern.permute.xlu0 %v339_v8 }
  0x3b   :  { %212 = vperm.xlu1 %304, %v27_v3  }
  0x3f   :  { %216 = vperm.xlu1 %304, %v28_v4  }
  0x43   :  { %305 = vset.pattern.permute.xlu1 %v339_v8 }
  0x44   :  { %238 = vperm.xlu1 %305, %v30_v9  }
  0x93   :  { %v63_v11 = vpop.permute.xlu1 %62  ;;  %v34_v12 = vpop.permute.xlu0 %33 }
  0x94   :  { %v57_v13 = vmul.f32 %v248_v10, %v34_v12 }
  0x96   :  { %v77_v16 = vadd.f32 %v63_v11, %v57_v13 }
  0x97   :  { %v67_v14 = vpop.permute.xlu1 %66  ;;  %v39_v15 = vpop.permute.xlu0 %38 }
  0x98   :  { %v58_v17 = vmul.f32 %v248_v10, %v39_v15  ;;  %v81_v20 = vmax.f32 %v77_v16, 0.0 }
  0x9a   :  { %v78_v18 = vadd.f32 %v67_v14, %v58_v17 }
  0x9b   :  { %v44_v19 = vpop.permute.xlu0 %43 }
  0x9c   :  { %v82_v21 = vmax.f32 %v78_v18, 0.0  ;;  %v49_v22 = vpop.permute.xlu1 %48  ;;  %v59_v24 = vmul.f32 %v248_v10, %v44_v19 }
  0x9d   :  { %v60_v25 = vmul.f32 %v248_v10, %v49_v22 }
  0x9e   :  { %v275_v23 = vpack.c.bf16 %v82_v21, %v81_v20 }
  0xa0   :  { %v71_v26 = vpop.permute.xlu0 %70  ;;  %276 = vmatprep.subr.bf16.mxu0 %v275_v23  ;;  %283 = vmatprep.subr.bf16.mxu1 %v275_v23 }
  0xa1   :  { %v79_v27 = vadd.f32 %v71_v26, %v59_v24  ;;  %v75_v28 = vpop.permute.xlu1 %74  ;;  %278 = vmatpush3.bf16.msra.mxu0 %v275_v23  ;;  %285 = vmatpush3.bf16.msra.mxu1 %v275_v23 }
  0xa2   :  { %v80_v29 = vadd.f32 %v75_v28, %v60_v25 }
  0xa3   :  { %v83_v30 = vmax.f32 %v79_v27, 0.0 }
  0xa4   :  { %v84_v31 = vmax.f32 %v80_v29, 0.0  ;;  %v104_v32 = vpop.permute.xlu0 %103 }
  0xa5   :  { %v102_v33 = vpop.permute.xlu1 %101 }
  0xa6   :  { %v279_v34 = vpack.c.bf16 %v84_v31, %v83_v30  ;;  %269 = vmatprep.mubr.msk.f32.mxu0 %vm109_vm0, %v102_v33 }
  0xa8   :  { %280 = vmatprep.subr.bf16.mxu0 %v279_v34  ;;  %284 = vmatprep.subr.bf16.mxu1 %v279_v34  ;;  %v108_v36 = vpop.permute.xlu0 %107 }
  0xa9   :  { %282 = vmatpush3.bf16.msra.mxu0 %v279_v34  ;;  %286 = vmatpush3.bf16.msra.mxu1 %v279_v34  ;;  %v106_v35 = vpop.permute.xlu1 %105 }
  0xaa   :  { %272 = vmatprep.mubr.msk.f32.mxu1 %vm109_vm0, %v106_v35 }
  0xac   :  { %270 = vmatmul.mubr.msk.f32.vlgmr.msra.gmra.mrb[0].mxu0 %vm109_vm0, %v104_v32  ;;  %273 = vmatmul.mubr.msk.f32.vlgmr.msra.gmra.mrb[0].mxu1 %vm109_vm0, %v108_v36  ;;  %v91_v39 = vpop.permute.xlu0 %90 }
  0xad   :  { %v87_v37 = vpop.permute.xlu1 %86 }
  0xb1   :  { %v95_v38 = vpop.permute.xlu1 %94  ;;  %v209_v42 = vpop.permute.xlu0 %208 }
  0xb5   :  { %v99_v40 = vpop.permute.xlu1 %98  ;;  %v221_v58 = vpop.permute.xlu0 %220 }
  0xba   :  { %v213_v41 = vpop.permute.xlu1 %212 }
  0xbe   :  { %v217_v57 = vpop.permute.xlu1 %216 }
  0xc3   :  { %v239_v5 = vpop.permute.xlu1 %238 }
 0x17f   :  { %v271_v43 = vpop.f32.mrb[0].mxu0  ;;  %v274_v44 = vpop.f32.mrb[0].mxu1 }
 0x180   :  { %v190_v45 = vadd.f32 %v271_v43, %v91_v39  ;;  %v184_v46 = vpop.f32.mrb[1].mxu0  ;;  %v194_v47 = vpop.f32.mrb[1].mxu1  ;;  %v200_v48 = vadd.f32 %v274_v44, %v99_v40 }
 0x181   :  { %v185_v49 = vadd.f32 %v184_v46, %v87_v37  ;;  %v195_v50 = vadd.f32 %v194_v47, %v95_v38 }
 0x182   :  { %v204_v51 = vmax.f32 %v190_v45, 0.0  ;;  %v206_v55 = vmax.f32 %v200_v48, 0.0 }
 0x183   :  { %v203_v52 = vmax.f32 %v185_v49, 0.0  ;;  %v205_v53 = vmax.f32 %v195_v50, 0.0 }
 0x184   :  { %v224_v54 = vmul.f32 %v213_v41, %v204_v51  ;;  %v226_v62 = vmul.f32 %v221_v58, %v206_v55 }
 0x185   :  { %v223_v56 = vmul.f32 %v209_v42, %v203_v52  ;;  %v225_v59 = vmul.f32 %v217_v57, %v205_v53 }
 0x187   :  { %v227_v60 = vadd.f32 %v224_v54, %v223_v56 }
 0x189   :  { %v228_v61 = vadd.f32 %v227_v60, %v225_v59 }
 0x18b   :  { %v229_v63 = vadd.f32 %v228_v61, %v226_v62 }
 0x18d   :  { %v230_v0 = vrot.slane %v229_v63, 4 }
 0x18f   :  { %v231_v1 = vadd.f32 %v230_v0, %v229_v63 }
 0x191   :  { %v232_v2 = vrot.slane %v231_v1, 2 }
 0x193   :  { %v233_v3 = vadd.f32 %v232_v2, %v231_v1 }
 0x195   :  { %v234_v4 = vrot.slane %v233_v3, 1 }
 0x197   :  { %v235_v6 = vadd.f32 %v234_v4, %v233_v3 }
 0x199   :  { %v241_v7 = vadd.f32 %v239_v5, %v235_v6 }
 0x19b   :  { %242 = vst [vmem:[%s375_s2] sm:$0x1] %v241_v7 }
 0x19c   :  { %247 = vsyncpa [#allocation3], 1 }

</bundles_post_ra>
